<compile_context>
chip_gen: v5e
topology: v5e:2x2
jax: 0.10.0
libtpu: 0.0.40
codegen_flags: <defaults>
</compile_context>

<pallas_src>
import functools

import jax
import jax.numpy as jnp
from jax.experimental import pallas as pl
from jax.experimental.pallas import tpu as pltpu

LANE = 128  # TPU lane width; output last dim should be a multiple of this.


def _round_up(x, m):
    return ((x + m - 1) // m) * m


def audio_encoder_kernel(x_ref, w_ref, b_ref, o_ref):
    # x_ref: (TM, K)   w_ref: (K, TN)   b_ref: (1, TN)   o_ref: (TM, TN)
    # Matmul accumulates in f32 on the MXU; bias-add + ReLU epilogue in f32.
    acc = jnp.dot(x_ref[...], w_ref[...], preferred_element_type=jnp.float32)
    y = acc + b_ref[...]
    o_ref[...] = jnp.maximum(y, 0.0).astype(o_ref.dtype)


def prepare_audio_encoder_params(weight, bias, *, param_dtype=jnp.float32):
    """One-time parameter prep (do NOT call per forward).

    weight: (hidden_dim, audio_dim)  -- PyTorch nn.Linear layout
    bias:   (hidden_dim,)

    Returns:
      w_kn: (audio_dim, n_pad) weight, transposed + zero-padded to a lane-dense
            (multiple-of-128) output width, optionally cast to param_dtype (bf16
            for production sizes).
      b2d:  (1, n_pad) bias in f32 (epilogue stays f32).
      hidden_dim: original output width (for slicing the padding off).
    """
    hidden_dim, audio_dim = weight.shape
    n_pad = _round_up(hidden_dim, LANE)
    w_kn = jnp.pad(weight.T, ((0, 0), (0, n_pad - hidden_dim))).astype(param_dtype)
    b2d = jnp.pad(bias.astype(jnp.float32), (0, n_pad - hidden_dim)).reshape(1, n_pad)
    return w_kn, b2d, hidden_dim


@functools.partial(jax.jit, static_argnames=("hidden_dim", "tile_m", "tile_n"))
def audio_encoder_forward(audio_feat, w_kn, b2d, hidden_dim, *, tile_m=512, tile_n=512):
    """relu(audio_feat @ W^T + b) with W in prepared (K, N_pad) layout.

    audio_feat: (..., audio_dim)
    w_kn:       (audio_dim, n_pad)  from prepare_audio_encoder_params
    b2d:        (1, n_pad)
    hidden_dim: original (unpadded) output width
    """
    orig_shape = audio_feat.shape
    K = orig_shape[-1]
    Kw, n_pad = w_kn.shape
    assert Kw == K, "weight K must match audio_feat last dim"

    x = audio_feat.reshape(-1, K)
    M = x.shape[0]
    out_dtype = audio_feat.dtype

    # ---- Tile sizing -------------------------------------------------------
    # Fat M tiles (amortize ~600-cycle grid-step overhead); a single block when
    # M is small. tile_m stays a multiple of 8 (f32 sublane packing).
    tm = min(tile_m, _round_up(M, 8))
    # Lane-dense N tiles: multiple of 128 that divides n_pad (n_pad is always a
    # multiple of 128, so tn=128 is a guaranteed fallback).
    tn = max(LANE, (min(tile_n, n_pad) // LANE) * LANE)
    while n_pad % tn != 0:
        tn -= LANE

    # Pad rows so the grid covers M exactly; padded rows are sliced off below.
    m_pad = _round_up(M, tm)
    if m_pad != M:
        x = jnp.pad(x, ((0, m_pad - M), (0, 0)))
    # Match compute dtype of the (possibly bf16) weights; accumulate in f32.
    if x.dtype != w_kn.dtype:
        x = x.astype(w_kn.dtype)

    grid = (m_pad // tm, n_pad // tn)

    itemsize = jnp.dtype(w_kn.dtype).itemsize
    cost = pl.CostEstimate(
        flops=2 * M * K * hidden_dim,
        transcendentals=0,
        bytes_accessed=(m_pad * K * itemsize          # x
                        + K * n_pad * itemsize        # W
                        + n_pad * 4                   # bias
                        + m_pad * n_pad * jnp.dtype(out_dtype).itemsize),  # out
    )

    out = pl.pallas_call(
        audio_encoder_kernel,
        out_shape=jax.ShapeDtypeStruct((m_pad, n_pad), out_dtype),
        grid_spec=pltpu.PrefetchScalarGridSpec(
            num_scalar_prefetch=0,
            grid=grid,
            in_specs=[
                pl.BlockSpec((tm, K), lambda i, j: (i, 0)),   # x row-tile
                pl.BlockSpec((K, tn), lambda i, j: (0, j)),   # W column-tile
                pl.BlockSpec((1, tn), lambda i, j: (0, j)),   # bias tile
            ],
            out_specs=pl.BlockSpec((tm, tn), lambda i, j: (i, j)),
        ),
        compiler_params=pltpu.CompilerParams(
            dimension_semantics=("parallel", "parallel"),
        ),
        cost_estimate=cost,
    )(x, w_kn, b2d)

    out = out[:M, :hidden_dim]
    return out.reshape(*orig_shape[:-1], hidden_dim)


def init_linear_params(key, audio_dim, hidden_dim):
    """Deterministic init mimicking nn.Linear default (uniform +-1/sqrt(fan_in))."""
    kw, kb = jax.random.split(key)
    bound = 1.0 / (audio_dim ** 0.5)
    weight = jax.random.uniform(kw, (hidden_dim, audio_dim), jnp.float32,
                                minval=-bound, maxval=bound)
    bias = jax.random.uniform(kb, (hidden_dim,), jnp.float32,
                              minval=-bound, maxval=bound)
    return weight, bias


if __name__ == "__main__":
    key = jax.random.PRNGKey(0)
    k_x, k_p = jax.random.split(key)

    batch, seq = 2, 8
    audio_dim, hidden_dim = 128, 32

    audio_feat = jax.random.normal(k_x, (batch, seq, audio_dim), jnp.float32)
    weight, bias = init_linear_params(k_p, audio_dim, hidden_dim)

    # One-time parameter prep (transpose + lane-pad). For production encoder
    # sizes on v6e/v7x, pass param_dtype=jnp.bfloat16 here for the bf16 MXU path.
    w_kn, b2d, hdim = prepare_audio_encoder_params(weight, bias)

    out = audio_encoder_forward(audio_feat, w_kn, b2d, hdim)
    jax.block_until_ready(out)

    # Reference check against plain JAX (same math as the PyTorch module).
    ref = jnp.maximum(audio_feat @ weight.T + bias, 0.0)
    assert out.shape == (batch, seq, hidden_dim)
    assert jnp.allclose(out, ref, atol=1e-5, rtol=1e-5)

    print("KERNEL_OK")
</pallas_src>

<mosaic_0001>
module attributes {stable_mosaic.version = 11 : i64} {
  func.func @audio_encoder_kernel(%arg0: i32, %arg1: i32, %arg2: memref<16x128xf32, #tpu.memory_space<vmem>>, %arg3: memref<128x128xf32, #tpu.memory_space<vmem>>, %arg4: memref<1x128xf32, #tpu.memory_space<vmem>>, %arg5: memref<16x128xf32, #tpu.memory_space<vmem>>) attributes {dimension_semantics = [#tpu.dimension_semantics<parallel>, #tpu.dimension_semantics<parallel>], iteration_bounds = array<i64: 1, 1>, scalar_prefetch = 0 : i64, scratch_operands = 0 : i64, tpu.core_type = #tpu.core_type<tc>, window_params = [{transform_indices = @transform_0, window_bounds = array<i64: 16, 128>}, {transform_indices = @transform_1, window_bounds = array<i64: 128, 128>}, {transform_indices = @transform_2, window_bounds = array<i64: 1, 128>}, {transform_indices = @transform_3, window_bounds = array<i64: 16, 128>}]} {
    %c0 = arith.constant 0 : index
    %c0_0 = arith.constant 0 : index
    %0 = vector.load %arg2[%c0, %c0_0] : memref<16x128xf32, #tpu.memory_space<vmem>>, vector<16x128xf32>
    %c0_1 = arith.constant 0 : index
    %c0_2 = arith.constant 0 : index
    %1 = vector.load %arg3[%c0_1, %c0_2] : memref<128x128xf32, #tpu.memory_space<vmem>>, vector<128x128xf32>
    %cst = arith.constant dense<0.000000e+00> : vector<16x128xf32>
    %2 = tpu.matmul %0, %1, %cst {dimension_numbers = #tpu.dot_dimension_numbers<[1], [0], [0], [1], [0, 0, 1, 1], [], []>} : vector<16x128xf32>, vector<128x128xf32>, vector<16x128xf32> -> vector<16x128xf32>
    %c0_3 = arith.constant 0 : index
    %c0_4 = arith.constant 0 : index
    %3 = vector.load %arg4[%c0_3, %c0_4] : memref<1x128xf32, #tpu.memory_space<vmem>>, vector<1x128xf32>
    %4 = vector.broadcast %3 : vector<1x128xf32> to vector<16x128xf32>
    %5 = arith.addf %2, %4 : vector<16x128xf32>
    %cst_5 = arith.constant 0.000000e+00 : f32
    %6 = vector.broadcast %cst_5 : f32 to vector<16x128xf32>
    %7 = arith.maximumf %5, %6 : vector<16x128xf32>
    %c0_6 = arith.constant 0 : index
    %c0_7 = arith.constant 0 : index
    %8 = vector.load %arg5[%c0_6, %c0_7] : memref<16x128xf32, #tpu.memory_space<vmem>>, vector<16x128xf32>
    tpu.vector_store %arg5[%c0_6, %c0_7], %7 {strides = array<i32>} : memref<16x128xf32, #tpu.memory_space<vmem>>, vector<16x128xf32>,
    return
  }
  func.func @transform_0(%arg0: i32, %arg1: i32) -> (i32, i32) {
    %c0_i32 = arith.constant 0 : i32
    %c0_i32_0 = arith.constant 0 : i32
    return %arg0, %c0_i32 : i32, i32
  }
  func.func @transform_1(%arg0: i32, %arg1: i32) -> (i32, i32) {
    %c0_i32 = arith.constant 0 : i32
    %c0_i32_0 = arith.constant 0 : i32
    return %c0_i32, %arg1 : i32, i32
  }
  func.func @transform_2(%arg0: i32, %arg1: i32) -> (i32, i32) {
    %c0_i32 = arith.constant 0 : i32
    %c0_i32_0 = arith.constant 0 : i32
    return %c0_i32, %arg1 : i32, i32
  }
  func.func @transform_3(%arg0: i32, %arg1: i32) -> (i32, i32) {
    %c0_i32 = arith.constant 0 : i32
    return %arg0, %arg1 : i32, i32
  }
}

</mosaic_0001>

<bundles_post_ra>
// kernel: audio_encoder_forward.1
= control target key start
LH: loop header
LB: loop body
LE: loop exit
PB: predicated region body
PF: predicated region fallthrough
CT: control target
= control target key end

     0   :  { %8 = vsyncpa [#allocation3], 0  ;;  %s213_s0 = inlined_call_operand.hbm [shape: f32[16,128], index: 0, kind: input, shape index: {}]   ;;  %s214_s1 = inlined_call_operand.hbm [shape: f32[128,128], index: 1, kind: input, shape index: {}]   ;;  %s215_s2 = inlined_call_operand.vmem [shape: f32[1,128], index: 2, kind: input, shape index: {}]   ;;  %s216_s3 = inlined_call_operand.vmem [shape: f32[16,128], index: 3, kind: output, shape index: {}]  }
   0x1   :  { %s14_s14 = sshll.u32 %s213_s0, 4  ;;  %s15_s14 = int_to_ptr.hbm [resolvable:$true] %s14_s14 }
   0x2   :  { %9 = vsyncpa [#allocation5], 0  ;;  %s174_s15 = smov [#allocation2]   ;;  %s27_s19 = sshll.u32 %s214_s1, 4  ;;  %s28_s19 = int_to_ptr.hbm [resolvable:$true] %s27_s19 }
   0x3   :  { %s16_s16 = sshll.u32 %s174_s15, 4  ;;  %s175_s20 = smov 128   ;;  %s17_s16 = int_to_ptr.vmem [resolvable:$true] %s16_s16 }
   0x4   :  { %s176_s21 = smov 8   ;;  %s177_s22 = smov [#allocation4]  }
   0x5   :  { %22 = dma.hbm_to_vmem [thread:$0]  %s15_s14, 256, %s17_s16, [#allocation3], %s175_s20, %s175_s20, %s176_s21  }
   0x6   :  { %s29_s23 = sshll.u32 %s177_s22, 4  ;;  %s30_s23 = int_to_ptr.vmem [resolvable:$true] %s29_s23 }
   0x7   :  { %35 = dma.hbm_to_vmem [thread:$0]  %s28_s19, 2048, %s30_s23, [#allocation5], %s175_s20, %s175_s20, %s176_s21  }
   0x8   :  { %170 = dma.done.wait [#allocation3], 256  }
   0x9   :  { %171 = vsyncadd [#allocation3], 4294967040 }
   0xa   :  { %172 = dma.done.wait [#allocation5], 2048  }
   0xb   :  { %173 = vsyncadd [#allocation5], 4294965248  ;;  %v63_v0 = vld [vmem:[#allocation4 + $0x78] sm:$0xff]  ;;  %v62_v1 = vld [vmem:[#allocation4 + $0x70] sm:$0xff] }
   0xc   :  { %68 = vmatpush.msra.mxu0 %v63_v0  ;;  %101 = vmatpush.msra.mxu1 %v63_v0  ;;  %v61_v2 = vld [vmem:[#allocation4 + $0x68] sm:$0xff]  ;;  %v60_v3 = vld [vmem:[#allocation4 + $0x60] sm:$0xff]  ;;  %v59_v4 = vld [vmem:[#allocation4 + $0x58] sm:$0xff] }
   0xd   :  { %v58_v5 = vld [vmem:[#allocation4 + $0x50] sm:$0xff]  ;;  %v57_v6 = vld [vmem:[#allocation4 + $0x48] sm:$0xff]  ;;  %v56_v7 = vld [vmem:[#allocation4 + $0x40] sm:$0xff] }
   0xe   :  { %69 = vmatpush.msra.mxu0 %v62_v1  ;;  %102 = vmatpush.msra.mxu1 %v62_v1  ;;  %v55_v8 = vld [vmem:[#allocation4 + $0x38] sm:$0xff]  ;;  %v54_v9 = vld [vmem:[#allocation4 + $0x30] sm:$0xff]  ;;  %v53_v10 = vld [vmem:[#allocation4 + $0x28] sm:$0xff] }
   0xf   :  { %v52_v11 = vld [vmem:[#allocation4 + $0x20] sm:$0xff]  ;;  %v51_v12 = vld [vmem:[#allocation4 + $0x18] sm:$0xff]  ;;  %v50_v13 = vld [vmem:[#allocation4 + $0x10] sm:$0xff] }
  0x10   :  { %70 = vmatpush.msra.mxu0 %v61_v2  ;;  %103 = vmatpush.msra.mxu1 %v61_v2  ;;  %v49_v14 = vld [vmem:[#allocation4 + $0x8] sm:$0xff]  ;;  %v48_v15 = vld [vmem:[#allocation4] sm:$0xff]  ;;  %v46_v16 = vld [vmem:[#allocation2] sm:$0xff] }
  0x11   :  { %v47_v17 = vld [vmem:[#allocation2 + $0x8] sm:$0xff]  ;;  %v121_v18 = vld [vmem:[%s215_s2] ss:$0 sm:$0xff] }
  0x12   :  { %71 = vmatpush.msra.mxu0 %v60_v3  ;;  %104 = vmatpush.msra.mxu1 %v60_v3 }
  0x14   :  { %72 = vmatpush.msra.mxu0 %v59_v4  ;;  %105 = vmatpush.msra.mxu1 %v59_v4 }
  0x16   :  { %73 = vmatpush.msra.mxu0 %v58_v5  ;;  %106 = vmatpush.msra.mxu1 %v58_v5 }
  0x18   :  { %74 = vmatpush.msra.mxu0 %v57_v6  ;;  %107 = vmatpush.msra.mxu1 %v57_v6 }
  0x1a   :  { %75 = vmatpush.msra.mxu0 %v56_v7  ;;  %108 = vmatpush.msra.mxu1 %v56_v7 }
  0x1c   :  { %76 = vmatpush.msra.mxu0 %v55_v8  ;;  %109 = vmatpush.msra.mxu1 %v55_v8 }
  0x1e   :  { %77 = vmatpush.msra.mxu0 %v54_v9  ;;  %110 = vmatpush.msra.mxu1 %v54_v9 }
  0x20   :  { %78 = vmatpush.msra.mxu0 %v53_v10  ;;  %111 = vmatpush.msra.mxu1 %v53_v10 }
  0x22   :  { %79 = vmatpush.msra.mxu0 %v52_v11  ;;  %112 = vmatpush.msra.mxu1 %v52_v11 }
  0x24   :  { %80 = vmatpush.msra.mxu0 %v51_v12  ;;  %113 = vmatpush.msra.mxu1 %v51_v12 }
  0x26   :  { %81 = vmatpush.msra.mxu0 %v50_v13  ;;  %114 = vmatpush.msra.mxu1 %v50_v13 }
  0x28   :  { %82 = vmatpush.msra.mxu0 %v49_v14  ;;  %115 = vmatpush.msra.mxu1 %v49_v14 }
  0x2a   :  { %83 = vmatpush.msra.mxu0 %v48_v15  ;;  %116 = vmatpush.msra.mxu1 %v48_v15 }
  0x2b   :  { %84 = vmatmul.f32.vlgmr.msra.gmra.mxu0 %v46_v16  ;;  %87 = vmatmul.f32.vlgmr.msra.gmra.mxu1 %v47_v17 }
  0xa8   :  { %v85_v19 = vpop.f32.mrf.mxu0  ;;  %v88_v20 = vpop.f32.mrf.mxu1 }
  0xa9   :  { %v86_v21 = vadd.f32 %v121_v18, %v85_v19  ;;  %v89_v22 = vadd.f32 %v121_v18, %v88_v20 }
  0xab   :  { %v91_v23 = vmax.f32 %v86_v21, 0.0  ;;  %v92_v24 = vmax.f32 %v89_v22, 0.0 }
  0xad   :  { %93 = vst [vmem:[%s216_s3] sm:$0xff] %v91_v23 }
  0xae   :  { %94 = vst [vmem:[%s216_s3 + $0x8] sm:$0xff] %v92_v24 }
  0xaf   :  { %99 = vsyncpa [#allocation3], 1 }
  0xb0   :  { %100 = vsyncpa [#allocation5], 1 }

</bundles_post_ra>
